<compile_context>
chip_gen: v7x
topology: tpu7x:2x2x1
jax: 0.10.0
libtpu: 0.0.40
codegen_flags: <defaults>
</compile_context>

<pallas_src>
import functools

import jax
import jax.numpy as jnp
import numpy as np
from jax.experimental import pallas as pl
from jax.experimental.pallas import tpu as pltpu


def _bce_partial_kernel(p_ref, t_ref, out_ref, *, num_classes, total_s,
                        rows_per_block, n_sblk, sigmoid):
    """grid = (n_par [parallel], n_sblk [arbitrary: spatial reduction]).

    p_ref : (B, C, R, 128) logits / probabilities
    t_ref : (B, R, 128)    integer (or float) label map
    out_ref: (1, R, 128)   per-parallel-slice partial sum (accumulator)
    """
    par = pl.program_id(0)
    sb = pl.program_id(1)
    R = rows_per_block

    @pl.when(sb == 0)
    def _init():
        out_ref[...] = jnp.zeros_like(out_ref)

    t = t_ref[...]                                   # (B, R, 128), reused for all classes

    acc = jnp.zeros((R, 128), jnp.float32)
    for c in range(num_classes):                     # small static loop -> unrolled
        x = p_ref[:, c, :, :].astype(jnp.float32)    # (B, R, 128), loaded per class
        y = (t == (c + 1)).astype(jnp.float32)       # one-hot slice for class c
        if sigmoid:
            # BCEWithLogitsLoss (stable): max(x,0) - x*y + log1p(exp(-|x|))
            l = (jnp.maximum(x, 0.0) - x * y
                 + jnp.log1p(jnp.exp(-jnp.abs(x))))
        else:
            # BCELoss on probabilities, with PyTorch's log clamp at -100.
            l = -(y * jnp.maximum(jnp.log(x), -100.0)
                  + (1.0 - y) * jnp.maximum(jnp.log1p(-x), -100.0))
        acc = acc + jnp.sum(l, axis=0)               # reduce over batch

    # Mask the spatial padding: flattened spatial index >= total_s contributes 0.
    row = jax.lax.broadcasted_iota(jnp.int32, (R, 128), 0)
    lane = jax.lax.broadcasted_iota(jnp.int32, (R, 128), 1)
    idx = (par * n_sblk + sb) * (R * 128) + row * 128 + lane
    acc = jnp.where(idx < total_s, acc, 0.0)

    out_ref[0] += acc


def bce_loss(predict, target, *, num_classes=4, sigmoid=True,
             rows_per_block=64, n_par=2):
    """Forward pass of the PyTorch BCELoss module (ignore_index=None)."""
    B, C = predict.shape[0], predict.shape[1]
    assert C == num_classes, "predict channel dim must equal num_classes"
    S = int(np.prod(predict.shape[2:]))
    assert int(np.prod(target.shape)) == B * S, "predict/target spatial mismatch"

    # Spatial tiling: R rows of 128 lanes per step, R a multiple of 8.
    n_rows = pl.cdiv(S, 128)
    rpb = max(8, (int(rows_per_block) // 8) * 8)
    R = min(rpb, ((n_rows + 7) // 8) * 8)
    n_sblk = pl.cdiv(n_rows, R * n_par)              # spatial blocks per parallel slice
    n_rows_pad = n_par * n_sblk * R
    s_pad = n_rows_pad * 128

    # VMEM budget check (2 inputs x 2 pipeline buffers of one block each).
    block_bytes = (B * C + B) * R * 128 * 4
    assert 2 * block_bytes < 12 * 1024 * 1024, "reduce rows_per_block (VMEM)"

    # Reshape only (free); pad spatial tail only when S is not tile-aligned.
    p_flat = predict.reshape(B, C, S)
    t_flat = target.reshape(B, S)
    if s_pad != S:
        p_flat = jnp.pad(p_flat, ((0, 0), (0, 0), (0, s_pad - S)))
        t_flat = jnp.pad(t_flat, ((0, 0), (0, s_pad - S)))
    p4 = p_flat.reshape(B, C, n_rows_pad, 128)
    t3 = t_flat.reshape(B, n_rows_pad, 128)

    kernel = functools.partial(
        _bce_partial_kernel, num_classes=int(num_classes), total_s=S,
        rows_per_block=R, n_sblk=n_sblk, sigmoid=bool(sigmoid))

    partial_sums = pl.pallas_call(
        kernel,
        out_shape=jax.ShapeDtypeStruct((n_par, R, 128), jnp.float32),
        grid_spec=pltpu.PrefetchScalarGridSpec(
            num_scalar_prefetch=0,
            grid=(n_par, n_sblk),
            in_specs=[
                pl.BlockSpec((B, C, R, 128),
                             lambda par, sb: (0, 0, par * n_sblk + sb, 0)),
                pl.BlockSpec((B, R, 128),
                             lambda par, sb: (0, par * n_sblk + sb, 0)),
            ],
            out_specs=pl.BlockSpec((1, R, 128), lambda par, sb: (par, 0, 0)),
        ),
        compiler_params=pltpu.CompilerParams(
            dimension_semantics=("parallel", "arbitrary")),
    )(p4, t3)

    # loss.mean() over the [B, C, H, W] elementwise loss tensor (tiny glue).
    return jnp.sum(partial_sums) / jnp.float32(B * C * S)


def _reference(predict, target, *, num_classes=4, sigmoid=True):
    """Pure-JAX transcription of the PyTorch forward (for verification)."""
    y = jnp.stack([(target == (i + 1)) for i in range(num_classes)],
                  axis=1).astype(jnp.float32)
    x = predict.astype(jnp.float32)
    if sigmoid:
        loss = jnp.maximum(x, 0.0) - x * y + jnp.log1p(jnp.exp(-jnp.abs(x)))
    else:
        loss = -(y * jnp.maximum(jnp.log(x), -100.0)
                 + (1.0 - y) * jnp.maximum(jnp.log1p(-x), -100.0))
    return jnp.mean(loss)


if __name__ == "__main__":
    key = jax.random.PRNGKey(0)
    B, C, H, W = 2, 4, 16, 16                       # num_classes = 4 (module default)
    kp, kt = jax.random.split(key)
    predict = jax.random.normal(kp, (B, C, H, W), dtype=jnp.float32)      # logits
    target = jax.random.randint(kt, (B, H, W), 0, C + 1, dtype=jnp.int32)  # labels 0..C

    loss = bce_loss(predict, target, num_classes=C, sigmoid=True)
    loss = jax.block_until_ready(loss)

    ref = _reference(predict, target, num_classes=C, sigmoid=True)
    np.testing.assert_allclose(np.asarray(loss), np.asarray(ref),
                               rtol=1e-5, atol=1e-6)
    print("KERNEL_OK")
</pallas_src>

<mosaic_0001>
module attributes {stable_mosaic.version = 11 : i64} {
  func.func @_bce_partial_kernel(%arg0: i32, %arg1: i32, %arg2: memref<2x4x8x128xf32, #tpu.memory_space<vmem>>, %arg3: memref<2x8x128xi32, #tpu.memory_space<vmem>>, %arg4: memref<1x8x128xf32, #tpu.memory_space<vmem>>) attributes {dimension_semantics = [#tpu.dimension_semantics<parallel>, #tpu.dimension_semantics<arbitrary>], iteration_bounds = array<i64: 2, 1>, scalar_prefetch = 0 : i64, scratch_operands = 0 : i64, tpu.core_type = #tpu.core_type<tc>, window_params = [{transform_indices = @transform_0, window_bounds = array<i64: 2, 4, 8, 128>}, {transform_indices = @transform_1, window_bounds = array<i64: 2, 8, 128>}, {transform_indices = @transform_2, window_bounds = array<i64: 1, 8, 128>}]} {
    %c0_i32 = arith.constant 0 : i32
    %0 = arith.cmpi eq, %arg1, %c0_i32 : i32
    %1 = arith.extui %0 : i1 to i32
    %c0_i32_0 = arith.constant 0 : i32
    %2 = arith.cmpi ne, %1, %c0_i32_0 : i32
    scf.if %2 {
      %cst_36 = arith.constant 0.000000e+00 : f32
      %97 = vector.broadcast %cst_36 : f32 to vector<1x8x128xf32>
      %c0_37 = arith.constant 0 : index
      %c0_38 = arith.constant 0 : index
      %c0_39 = arith.constant 0 : index
      %98 = vector.load %arg4[%c0_37, %c0_38, %c0_39] : memref<1x8x128xf32, #tpu.memory_space<vmem>>, vector<1x8x128xf32>
      tpu.vector_store %arg4[%c0_37, %c0_38, %c0_39], %97 {strides = array<i32>} : memref<1x8x128xf32, #tpu.memory_space<vmem>>, vector<1x8x128xf32>,
    } else {
    }
    %c0 = arith.constant 0 : index
    %c0_1 = arith.constant 0 : index
    %c0_2 = arith.constant 0 : index
    %3 = vector.load %arg3[%c0, %c0_1, %c0_2] : memref<2x8x128xi32, #tpu.memory_space<vmem>>, vector<2x8x128xi32>
    %cst = arith.constant 0.000000e+00 : f32
    %4 = vector.broadcast %cst : f32 to vector<8x128xf32>
    %c0_3 = arith.constant 0 : index
    %c0_4 = arith.constant 0 : index
    %c0_5 = arith.constant 0 : index
    %c0_6 = arith.constant 0 : index
    %5 = vector.load %arg2[%c0_3, %c0_4, %c0_5, %c0_6] : memref<2x4x8x128xf32, #tpu.memory_space<vmem>>, vector<2x1x8x128xf32>
    %6 = vector.shape_cast %5 : vector<2x1x8x128xf32> to vector<2x8x128xf32>
    %c1_i32 = arith.constant 1 : i32
    %7 = vector.broadcast %c1_i32 : i32 to vector<2x8x128xi32>
    %8 = arith.cmpi eq, %3, %7 : vector<2x8x128xi32>
    %9 = arith.extui %8 : vector<2x8x128xi1> to vector<2x8x128xi32>
    %10 = arith.sitofp %9 : vector<2x8x128xi32> to vector<2x8x128xf32>
    %cst_7 = arith.constant 0.000000e+00 : f32
    %11 = vector.broadcast %cst_7 : f32 to vector<2x8x128xf32>
    %12 = arith.maximumf %6, %11 : vector<2x8x128xf32>
    %13 = arith.mulf %6, %10 : vector<2x8x128xf32>
    %14 = arith.subf %12, %13 : vector<2x8x128xf32>
    %15 = math.absf %6 : vector<2x8x128xf32>
    %cst_8 = arith.constant 0.000000e+00 : f32
    %16 = vector.broadcast %cst_8 : f32 to vector<2x8x128xf32>
    %17 = arith.subf %16, %15 : vector<2x8x128xf32>
    %18 = math.exp %17 : vector<2x8x128xf32>
    %19 = math.log1p %18 : vector<2x8x128xf32>
    %20 = arith.addf %14, %19 : vector<2x8x128xf32>
    %cst_9 = arith.constant dense<0.000000e+00> : vector<8x128xf32>
    %21 = vector.multi_reduction <add>, %20, %cst_9 [0] : vector<2x8x128xf32> to vector<8x128xf32>
    %22 = arith.addf %4, %21 : vector<8x128xf32>
    %c0_10 = arith.constant 0 : index
    %c1 = arith.constant 1 : index
    %c0_11 = arith.constant 0 : index
    %c0_12 = arith.constant 0 : index
    %23 = vector.load %arg2[%c0_10, %c1, %c0_11, %c0_12] : memref<2x4x8x128xf32, #tpu.memory_space<vmem>>, vector<2x1x8x128xf32>
    %24 = vector.shape_cast %23 : vector<2x1x8x128xf32> to vector<2x8x128xf32>
    %c2_i32 = arith.constant 2 : i32
    %25 = vector.broadcast %c2_i32 : i32 to vector<2x8x128xi32>
    %26 = arith.cmpi eq, %3, %25 : vector<2x8x128xi32>
    %27 = arith.extui %26 : vector<2x8x128xi1> to vector<2x8x128xi32>
    %28 = arith.sitofp %27 : vector<2x8x128xi32> to vector<2x8x128xf32>
    %cst_13 = arith.constant 0.000000e+00 : f32
    %29 = vector.broadcast %cst_13 : f32 to vector<2x8x128xf32>
    %30 = arith.maximumf %24, %29 : vector<2x8x128xf32>
    %31 = arith.mulf %24, %28 : vector<2x8x128xf32>
    %32 = arith.subf %30, %31 : vector<2x8x128xf32>
    %33 = math.absf %24 : vector<2x8x128xf32>
    %cst_14 = arith.constant 0.000000e+00 : f32
    %34 = vector.broadcast %cst_14 : f32 to vector<2x8x128xf32>
    %35 = arith.subf %34, %33 : vector<2x8x128xf32>
    %36 = math.exp %35 : vector<2x8x128xf32>
    %37 = math.log1p %36 : vector<2x8x128xf32>
    %38 = arith.addf %32, %37 : vector<2x8x128xf32>
    %cst_15 = arith.constant dense<0.000000e+00> : vector<8x128xf32>
    %39 = vector.multi_reduction <add>, %38, %cst_15 [0] : vector<2x8x128xf32> to vector<8x128xf32>
    %40 = arith.addf %22, %39 : vector<8x128xf32>
    %c0_16 = arith.constant 0 : index
    %c2 = arith.constant 2 : index
    %c0_17 = arith.constant 0 : index
    %c0_18 = arith.constant 0 : index
    %41 = vector.load %arg2[%c0_16, %c2, %c0_17, %c0_18] : memref<2x4x8x128xf32, #tpu.memory_space<vmem>>, vector<2x1x8x128xf32>
    %42 = vector.shape_cast %41 : vector<2x1x8x128xf32> to vector<2x8x128xf32>
    %c3_i32 = arith.constant 3 : i32
    %43 = vector.broadcast %c3_i32 : i32 to vector<2x8x128xi32>
    %44 = arith.cmpi eq, %3, %43 : vector<2x8x128xi32>
    %45 = arith.extui %44 : vector<2x8x128xi1> to vector<2x8x128xi32>
    %46 = arith.sitofp %45 : vector<2x8x128xi32> to vector<2x8x128xf32>
    %cst_19 = arith.constant 0.000000e+00 : f32
    %47 = vector.broadcast %cst_19 : f32 to vector<2x8x128xf32>
    %48 = arith.maximumf %42, %47 : vector<2x8x128xf32>
    %49 = arith.mulf %42, %46 : vector<2x8x128xf32>
    %50 = arith.subf %48, %49 : vector<2x8x128xf32>
    %51 = math.absf %42 : vector<2x8x128xf32>
    %cst_20 = arith.constant 0.000000e+00 : f32
    %52 = vector.broadcast %cst_20 : f32 to vector<2x8x128xf32>
    %53 = arith.subf %52, %51 : vector<2x8x128xf32>
    %54 = math.exp %53 : vector<2x8x128xf32>
    %55 = math.log1p %54 : vector<2x8x128xf32>
    %56 = arith.addf %50, %55 : vector<2x8x128xf32>
    %cst_21 = arith.constant dense<0.000000e+00> : vector<8x128xf32>
    %57 = vector.multi_reduction <add>, %56, %cst_21 [0] : vector<2x8x128xf32> to vector<8x128xf32>
    %58 = arith.addf %40, %57 : vector<8x128xf32>
    %c0_22 = arith.constant 0 : index
    %c3 = arith.constant 3 : index
    %c0_23 = arith.constant 0 : index
    %c0_24 = arith.constant 0 : index
    %59 = vector.load %arg2[%c0_22, %c3, %c0_23, %c0_24] : memref<2x4x8x128xf32, #tpu.memory_space<vmem>>, vector<2x1x8x128xf32>
    %60 = vector.shape_cast %59 : vector<2x1x8x128xf32> to vector<2x8x128xf32>
    %c4_i32 = arith.constant 4 : i32
    %61 = vector.broadcast %c4_i32 : i32 to vector<2x8x128xi32>
    %62 = arith.cmpi eq, %3, %61 : vector<2x8x128xi32>
    %63 = arith.extui %62 : vector<2x8x128xi1> to vector<2x8x128xi32>
    %64 = arith.sitofp %63 : vector<2x8x128xi32> to vector<2x8x128xf32>
    %cst_25 = arith.constant 0.000000e+00 : f32
    %65 = vector.broadcast %cst_25 : f32 to vector<2x8x128xf32>
    %66 = arith.maximumf %60, %65 : vector<2x8x128xf32>
    %67 = arith.mulf %60, %64 : vector<2x8x128xf32>
    %68 = arith.subf %66, %67 : vector<2x8x128xf32>
    %69 = math.absf %60 : vector<2x8x128xf32>
    %cst_26 = arith.constant 0.000000e+00 : f32
    %70 = vector.broadcast %cst_26 : f32 to vector<2x8x128xf32>
    %71 = arith.subf %70, %69 : vector<2x8x128xf32>
    %72 = math.exp %71 : vector<2x8x128xf32>
    %73 = math.log1p %72 : vector<2x8x128xf32>
    %74 = arith.addf %68, %73 : vector<2x8x128xf32>
    %cst_27 = arith.constant dense<0.000000e+00> : vector<8x128xf32>
    %75 = vector.multi_reduction <add>, %74, %cst_27 [0] : vector<2x8x128xf32> to vector<8x128xf32>
    %76 = arith.addf %58, %75 : vector<8x128xf32>
    %77 = tpu.iota {dimensions = array<i32: 0>} : vector<8x128xi32>
    %78 = tpu.iota {dimensions = array<i32: 1>} : vector<8x128xi32>
    %c1_i32_28 = arith.constant 1 : i32
    %79 = arith.muli %arg0, %c1_i32_28 : i32
    %80 = arith.addi %79, %arg1 : i32
    %c1024_i32 = arith.constant 1024 : i32
    %81 = arith.muli %80, %c1024_i32 : i32
    %c128_i32 = arith.constant 128 : i32
    %82 = vector.broadcast %c128_i32 : i32 to vector<8x128xi32>
    %83 = arith.muli %77, %82 : vector<8x128xi32>
    %84 = vector.broadcast %81 : i32 to vector<8x128xi32>
    %85 = arith.addi %84, %83 : vector<8x128xi32>
    %86 = arith.addi %85, %78 : vector<8x128xi32>
    %c256_i32 = arith.constant 256 : i32
    %87 = vector.broadcast %c256_i32 : i32 to vector<8x128xi32>
    %88 = arith.cmpi slt, %86, %87 : vector<8x128xi32>
    %cst_29 = arith.constant 0.000000e+00 : f32
    %89 = vector.broadcast %cst_29 : f32 to vector<8x128xf32>
    %90 = arith.select %88, %76, %89 : vector<8x128xi1>, vector<8x128xf32>
    %c0_30 = arith.constant 0 : index
    %c0_31 = arith.constant 0 : index
    %c0_32 = arith.constant 0 : index
    %91 = vector.load %arg4[%c0_30, %c0_31, %c0_32] : memref<1x8x128xf32, #tpu.memory_space<vmem>>, vector<1x8x128xf32>
    %92 = vector.shape_cast %91 : vector<1x8x128xf32> to vector<8x128xf32>
    %93 = arith.addf %92, %90 : vector<8x128xf32>
    %c0_33 = arith.constant 0 : index
    %c0_34 = arith.constant 0 : index
    %c0_35 = arith.constant 0 : index
    %94 = vector.load %arg4[%c0_33, %c0_34, %c0_35] : memref<1x8x128xf32, #tpu.memory_space<vmem>>, vector<1x8x128xf32>
    %95 = vector.shape_cast %94 : vector<1x8x128xf32> to vector<8x128xf32>
    %96 = vector.shape_cast %93 : vector<8x128xf32> to vector<1x8x128xf32>
    tpu.vector_store %arg4[%c0_33, %c0_34, %c0_35], %96 {strides = array<i32>} : memref<1x8x128xf32, #tpu.memory_space<vmem>>, vector<1x8x128xf32>,
    return
  }
  func.func @transform_0(%arg0: i32, %arg1: i32) -> (i32, i32, i32, i32) {
    %c1_i32 = arith.constant 1 : i32
    %0 = arith.muli %arg0, %c1_i32 : i32
    %1 = arith.addi %0, %arg1 : i32
    %c0_i32 = arith.constant 0 : i32
    %c0_i32_0 = arith.constant 0 : i32
    %c0_i32_1 = arith.constant 0 : i32
    %c0_i32_2 = arith.constant 0 : i32
    return %c0_i32, %c0_i32_0, %1, %c0_i32_1 : i32, i32, i32, i32
  }
  func.func @transform_1(%arg0: i32, %arg1: i32) -> (i32, i32, i32) {
    %c1_i32 = arith.constant 1 : i32
    %0 = arith.muli %arg0, %c1_i32 : i32
    %1 = arith.addi %0, %arg1 : i32
    %c0_i32 = arith.constant 0 : i32
    %c0_i32_0 = arith.constant 0 : i32
    %c0_i32_1 = arith.constant 0 : i32
    return %c0_i32, %1, %c0_i32_0 : i32, i32, i32
  }
  func.func @transform_2(%arg0: i32, %arg1: i32) -> (i32, i32, i32) {
    %c0_i32 = arith.constant 0 : i32
    %c0_i32_0 = arith.constant 0 : i32
    %c0_i32_1 = arith.constant 0 : i32
    return %arg0, %c0_i32, %c0_i32_0 : i32, i32, i32
  }
}

</mosaic_0001>

<bundles_post_ra>
// kernel: tpu_custom_call.1
= control target key start
LH: loop header
LB: loop body
LE: loop exit
PB: predicated region body
PF: predicated region fallthrough
CT: control target
= control target key end

     0   :  { %7 = vsyncpa [#allocation3], 0  ;;  %s1230_s0 = inlined_call_operand.hbm [shape: f32[2,4,16,128], index: 0, kind: input, shape index: {}]   ;;  %s1231_s1 = inlined_call_operand.hbm [shape: s32[2,16,128], index: 1, kind: input, shape index: {}]   ;;  %s1232_s2 = inlined_call_operand.hbm [shape: f32[2,8,128], index: 2, kind: output, shape index: {}]  }
   0x1   :  { %9 = vsyncpa [#allocation3 + $0x1], 0 }
   0x2   :  { %10 = vsyncpa [#allocation6], 0 }
   0x3   :  { %12 = vsyncpa [#allocation6 + $0x1], 0 }
   0x4   :  { %13 = vsyncpa [#allocation4], 0 }
   0x5   :  { %15 = vsyncpa [#allocation4 + $0x1], 0  ;;  %s842_s9 = smov 0   ;;  %s844_s10 = smov 0  }
   0x6   :  { %s846_s11 = smov 0   ;;  %s848_s12 = smov 0  }
   0x7   :  { %s850_s13 = smov 0   ;;  %s852_s14 = smov 0  }
   0x8 LB: > { %s538_s15 = sadd.s32 4294967295, %s818_s14   ;;  %s539_s16 = sadd.s32 4294967294, %s818_s14   ;;  %s818_s14 = sphi %s852_s14, %s21_s14   ;;  %s814_s13 = sphi %s850_s13, %s1259_s13   ;;  %s810_s12 = sphi %s848_s12, %s1258_s12   ;;  %s806_s11 = sphi %s846_s11, %s1257_s11   ;;  %s802_s10 = sphi %s844_s10, %s1256_s10   ;;  %s798_s9 = sphi %s842_s9, %s1255_s9  }
   0x9   : > { %s33_s17 = sadd.s32 1, %s814_s13  ;;  %s42_s18 = sadd.s32 1, %s806_s11 }
   0xa   : > { %p35_p0 = scmp.ge.s32.totalorder %s33_s17, 2  ;;  %p49_p1 = scmp.ne.s32.totalorder %s806_s11, %s802_s10 }
   0xb   : > { %p50_p2 = scmp.eq.s32.totalorder %s818_s14, 0  ;;  %p55_p3 = scmp.ne.s32.totalorder %s802_s10, %s798_s9 }
   0xc   : > { %s1261_s17 = smov (%p35_p0, %s33_s17), 0  ;;  %p56_p5 = scmp.eq.s32.totalorder %s538_s15, 0 }
   0xd   : > { %p883_p4 = por %p50_p2, %p49_p1  ;;  %s39_s20 = ssub.s32 %s814_s13, %s1261_s17 }
   0xe   : > { %p107_p6 = scmp.eq.s32.totalorder %s538_s15, 1  ;;  %p40_p7 = scmp.eq.s32.totalorder %s39_s20, 0 }
   0xf   : > { %p889_p8 = por %p56_p5, %p55_p3  ;;  %p113_p10 = scmp.eq.s32.totalorder %s539_s16, 1 }
  0x10   : > { %p893_p9 = por %p107_p6, %p49_p1  ;;  %p586_p13 = scmp.lt.s32.totalorder %s818_s14, 2 }
  0x11   : > { %s1236_s21 = scalar_select %p889_p8, 1, 0 }
  0x12   : > { %s1237_s22 = scalar_select %p893_p9, 1, 0 }
  0x13   : > { %s898_s23 = scalar_select %p40_p7, %s806_s11, %s42_s18  }
  0x14   : > { %p900_p11 = por %p113_p10, %p55_p3  ;;  %s907_s25 = sand.u32 1, %s806_s11  }
  0x15   : > { %s542_s26 = sshll.u32 %s907_s25, 6  ;;  %s543_s27 = sshll.u32 %s814_s13, 7 }
  0x16   : > { %s1238_s24 = scalar_select %p900_p11, 1, 0 }
  0x17   : > { %s916_s30 = scalar_lea.hbm %s1230_s0, %s543_s27  ;;  %s137_s3 = scalar_lea.vmem [#allocation2], %s542_s26 }
  0x18   : > { %s144_s4 = sshll.u32 %s137_s3, 4  ;;  %p922_p0 = pnand %p586_p13, %p883_p4  ;;  %s918_s4 = int_to_ptr.vmem [resolvable:$true] %s144_s4 }
  0x19   : > { %s134_s6 = scalar_lea.sflag [#allocation3], %s907_s25  ;;  %s672_s7 = scalar_lea.hbm %s916_s30, 1024 }
  0x1a   : > { %p673_p1 = scmp.ne.s32.totalorder %s916_s30, %s672_s7  ;;  %p674_p2 = pneg %p922_p0 }
  0x1b   : > { %s677_s16 = scalar_lea.hbm %s1230_s0, 2048  ;;  %p678_p4 = scmp.lt.u32.totalorder %s916_s30, %s1230_s0 }
  0x1c   : > { %p675_p3 = pnand %p674_p2, %p673_p1  ;;  %p679_p6 = scmp.lt.u32.totalorder %s677_s16, %s672_s7 }
  0x1d   : > { %p681_p10 = scmp.lt.u32.totalorder %s672_s7, %s916_s30 }
  0x1e   : > { %p676_p5 = pneg %p675_p3  ;;  %p680_p7 = por %p679_p6, %p678_p4 }
  0x20   : > { %p682_p13 = por %p681_p10, %p680_p7 }
  0x22   : > { %p683_p12 = pnand %p682_p13, %p676_p5 }
  0x24   : > { %686 = shalt.err (!%p683_p12)
}
  0x25   : > { %s687_s20 = scalar_lea.vmem %s918_s4, 1024  ;;  %s820_s26 = smov [#allocation2]  }
  0x26   : > { %p688_p1 = scmp.ne.s32.totalorder %s918_s4, %s687_s20  ;;  %s692_s28 = sshll.u32 %s820_s26, 4  ;;  %s693_s28 = int_to_ptr.vmem [resolvable:$false] %s692_s28 }
  0x27   : > { %s694_s29 = scalar_lea.vmem %s693_s28, 2048  ;;  %p695_p9 = scmp.lt.s32.totalorder %s918_s4, %s693_s28 }
  0x28   : > { %p690_p3 = pnand %p688_p1, %p674_p2  ;;  %p696_p4 = scmp.lt.s32.totalorder %s694_s29, %s687_s20 }
  0x2a   : > { %p691_p11 = pneg %p690_p3  ;;  %p697_p6 = por %p696_p4, %p695_p9 }
  0x2c   : > { %p698_p7 = pnand %p697_p6, %p691_p11 }
  0x2e   : > { %701 = shalt.err (!%p698_p7)
}
  0x2f   : > { %s821_s3 = smov 256   ;;  %s822_s7 = smov 128  }
  0x30   : > { %s823_s8 = smov 8   ;;  %p546_p9 = scmp.ge.s32.totalorder %s818_s14, 1 }
  0x31   : > { %578 = dma.hbm_to_vmem [thread:$0]  (!%p922_p0), %s916_s30, 1024, %s918_s4, %s134_s6, %s821_s3, %s822_s7, %s823_s8  }
  0x32   : > { %p173_p11 = scmp.lt.s32.totalorder %s818_s14, 3  ;;  %s544_s15 = sshll.u32 %s907_s25, 4 }
  0x33   : > { %s969_s20 = scalar_lea.hbm %s1231_s1, %s543_s27  ;;  %s158_s26 = scalar_lea.vmem [#allocation5], %s544_s15 }
  0x34   : > { %p960_p12 = pnand %p546_p9, %p173_p11  ;;  %s165_s28 = sshll.u32 %s158_s26, 4  ;;  %s971_s28 = int_to_ptr.vmem [resolvable:$true] %s165_s28 }
  0x35   : > { %s155_s30 = scalar_lea.sflag [#allocation6], %s907_s25  ;;  %s702_s4 = scalar_lea.hbm %s969_s20, 256 }
  0x36   : > { %p703_p5 = scmp.ne.s32.totalorder %s969_s20, %s702_s4  ;;  %s707_s27 = scalar_lea.hbm %s1231_s1, 512 }
  0x37   : > { %p708_p1 = scmp.lt.u32.totalorder %s969_s20, %s1231_s1  ;;  %p709_p3 = scmp.lt.u32.totalorder %s707_s27, %s702_s4 }
  0x38   : > { %p705_p10 = pnand %p703_p5, %p674_p2  ;;  %p711_p6 = scmp.lt.u32.totalorder %s702_s4, %s969_s20 }
  0x39   : > { %p710_p4 = por %p709_p3, %p708_p1 }
  0x3a   : > { %p706_p13 = pneg %p705_p10 }
  0x3b   : > { %p712_p7 = por %p711_p6, %p710_p4 }
  0x3d   : > { %p713_p9 = pnand %p712_p7, %p706_p13 }
  0x3f   : > { %716 = shalt.err (!%p713_p9)
}
  0x40   : > { %s717_s15 = scalar_lea.vmem %s971_s28, 256  ;;  %s824_s26 = smov [#allocation5]  }
  0x41   : > { %p718_p11 = scmp.ne.s32.totalorder %s971_s28, %s717_s15  ;;  %s722_s6 = sshll.u32 %s824_s26, 4  ;;  %s723_s6 = int_to_ptr.vmem [resolvable:$false] %s722_s6 }
  0x42   : > { %s724_s29 = scalar_lea.vmem %s723_s6, 512  ;;  %p725_p8 = scmp.lt.s32.totalorder %s971_s28, %s723_s6 }
  0x43   : > { %p720_p5 = pnand %p718_p11, %p674_p2  ;;  %p726_p1 = scmp.lt.s32.totalorder %s724_s29, %s717_s15 }
  0x45   : > { %p721_p10 = pneg %p720_p5  ;;  %p727_p3 = por %p726_p1, %p725_p8 }
  0x47   : > { %p728_p4 = pnand %p727_p3, %p721_p10 }
  0x49   : > { %731 = shalt.err (!%p728_p4)
}
  0x4a   : > { %581 = dma.hbm_to_vmem [thread:$0]  (!%p922_p0), %s969_s20, 256, %s971_s28, %s155_s30, %s821_s3, %s822_s7, %s823_s8  }
  0x4b   : > { %177 = sbr.rel (%p960_p12) target bundleno = 157 (0x9d), region = 28  ;;  %s1005_s4 = sand.u32 (!%p960_p12), 1, %s802_s10  }
  0x4c   : > { %s547_s27 = sshll.u32 (!%p960_p12), %s1005_s4, 6  ;;  %s180_s18 = scalar_lea.sflag (!%p960_p12), [#allocation3], %s1005_s4 }
  0x4d   : > { %s1009_s5 = scalar_lea.vmem (!%p960_p12), [#allocation2], %s547_s27  ;;  %p1241_p8 = scmp.ne.s32.totalorder (!%p960_p12), %s1236_s21, 0 }
  0x52   : > { %785 = dma.done.wait (%p1241_p8), %s180_s18, 1024  }
  0x53   : > { %787 = vsyncadd (%p1241_p8), %s180_s18, 4294966272  ;;  %s548_s25 = sshll.u32 %s1005_s4, 4  ;;  %s189_s3 = scalar_lea.sflag [#allocation6], %s1005_s4 }
  0x54   : > { %s192_s7 = scalar_lea.vmem [#allocation5], %s548_s25 }
  0x55   : > { %789 = dma.done.wait (%p1241_p8), %s189_s3, 256  }
  0x56   : > { %791 = vsyncadd (%p1241_p8), %s189_s3, 4294967040  ;;  %v1022_v0 = vld [vmem:[%s1009_s5] sm:$0xff]  ;;  %v1030_v6 = vld [vmem:[%s1009_s5 + $0x8] sm:$0xff]  ;;  %v406_v9 = vlaneseq  ;;  %s564_s21 = sshll.u32 %s810_s12, 10  ;;  %v825_v28 = vmov 0.0   ;;  %s549_s8 = sshll.u32 %s1005_s4, 3 }
  0x57   : > { %v1025_v1 = vld [vmem:[%s1009_s5 + $0x20] sm:$0xff]  ;;  %v241_v2 = vand.u32 2147483647, %v1022_v0  ;;  %v1033_v7 = vld [vmem:[%s1009_s5 + $0x28] sm:$0xff]  ;;  %v286_v12 = vand.u32 2147483647, %v1030_v6  ;;  %v1069_v37 = vstv %s564_s21 }
  0x58   : > { %v242_v3 = vand.u32 2147483647, %v1025_v1  ;;  %v1035_v11 = vld [vmem:[%s192_s7] sm:$0xff]  ;;  %v287_v13 = vand.u32 2147483647, %v1033_v7  ;;  %v1042_v15 = vld [vmem:[%s192_s7 + $0x8] sm:$0xff] }
  0x59   : > { %v243_v4 = vsub.f32 0.0, %v241_v2  ;;  %v1040_v14 = vld [vmem:[%s1009_s5 + $0x10] sm:$0xff]  ;;  %v288_v16 = vsub.f32 0.0, %v286_v12  ;;  %v1048_v19 = vshrl.u32 %v406_v9, 7  ;;  %vm229_vm0 = vcmp.eq.s32.totalorder %v1035_v11, 1  ;;  %v1055_v25 = vld [vmem:[%s1009_s5 + $0x18] sm:$0xff] }
  0x5a   : > { %v244_v5 = vsub.f32 0.0, %v242_v3  ;;  %v289_v17 = vsub.f32 0.0, %v287_v13  ;;  %v1045_v18 = vld [vmem:[%s1009_s5 + $0x30] sm:$0xff]  ;;  %v331_v22 = vand.u32 2147483647, %v1040_v14  ;;  %vm230_vm1 = vcmp.eq.s32.totalorder %v1042_v15, 1 }
  0x5b   : > { %v245_v8 = vmul.f32 1.442695, %v243_v4  ;;  %v290_v20 = vmul.f32 1.442695, %v288_v16  ;;  %v332_v23 = vand.u32 2147483647, %v1045_v18 }
  0x5c   : > { %v247_v10 = vmul.f32 1.442695, %v244_v5  ;;  %v292_v21 = vmul.f32 1.442695, %v289_v17  ;;  %v333_v24 = vsub.f32 0.0, %v331_v22  ;;  %v1058_v26 = vld [vmem:[%s1009_s5 + $0x38] sm:$0xff] }
  0x5d   : > { %640 = vpow2.f32 %v245_v8  ;;  %v412_v27 = vmul.u32 128, %v1048_v19  ;;  %v550_v29 = vsel %vm229_vm0, 1.0, %v825_v28  ;;  %v235_v30 = vmax.f32 %v1022_v0, 0.0  ;;  %s566_s16 = sshll.u32 %s810_s12, 7  ;;  %s217_s20 = scalar_lea.vmem [#allocation7], %s549_s8 }
  0x5e   : > { %642 = vpow2.f32 %v247_v10  ;;  %v334_v31 = vsub.f32 0.0, %v332_v23  ;;  %v551_v32 = vsel %vm230_vm1, 1.0, %v825_v28  ;;  %vm274_vm2 = vcmp.eq.s32.totalorder %v1035_v11, 2  ;;  %s435_s28 = sshll.u32 %s217_s20, 4  ;;  %s1181_s15 = scalar_lea.hbm %s1232_s2, %s566_s16  ;;  %s1183_s28 = int_to_ptr.vmem [resolvable:$true] %s435_s28 }
  0x5f   : > { %644 = vpow2.f32 %v290_v20  ;;  %vm275_vm3 = vcmp.eq.s32.totalorder %v1042_v15, 2  ;;  %v335_v33 = vmul.f32 1.442695, %v333_v24  ;;  %v376_v35 = vand.u32 2147483647, %v1055_v25  ;;  %s422_s26 = scalar_lea.sflag [#allocation4], %s1005_s4 }
  0x60   : > { %646 = vpow2.f32 %v292_v21  ;;  %v337_v34 = vmul.f32 1.442695, %v334_v31  ;;  %v377_v36 = vand.u32 2147483647, %v1058_v26  ;;  %v236_v39 = vmax.f32 %v1025_v1, 0.0  ;;  %s732_s6 = scalar_lea.vmem %s1183_s28, 128 }
  0x61   : > { %v237_v40 = vmul.f32 %v550_v29, %v1022_v0  ;;  %vm319_vm4 = vcmp.eq.s32.totalorder %v1035_v11, 3  ;;  %648 = vpow2.f32 %v335_v33  ;;  %v554_v43 = vsel %vm274_vm2, 1.0, %v825_v28  ;;  %p733_p0 = scmp.ne.s32.totalorder %s1183_s28, %s732_s6  ;;  %p1252_p2 = scmp.ne.s32.totalorder %s1237_s22, 0 }
  0x62   : > { %vm320_vm5 = vcmp.eq.s32.totalorder %v1042_v15, 3  ;;  %650 = vpow2.f32 %v337_v34  ;;  %v238_v44 = vmul.f32 %v551_v32, %v1025_v1  ;;  %v555_v46 = vsel %vm275_vm3, 1.0, %v825_v28  ;;  %s826_s12 = smov [#allocation7]  }
  0x63   : > { %v378_v47 = vsub.f32 0.0, %v376_v35  ;;  %v280_v48 = vmax.f32 %v1030_v6, 0.0  ;;  %v558_v49 = vsel %vm319_vm4, 1.0, %v825_v28  ;;  %v379_v50 = vsub.f32 0.0, %v377_v36  ;;  %p734_p12 = pnand %p733_p0, %p1252_p2  ;;  %s736_s29 = sshll.u32 %s826_s12, 4  ;;  %s737_s29 = int_to_ptr.vmem [resolvable:$false] %s736_s29 }
  0x64   : > { %v282_v51 = vmul.f32 %v554_v43, %v1030_v6  ;;  %v559_v52 = vsel %vm320_vm5, 1.0, %v825_v28  ;;  %v281_v54 = vmax.f32 %v1033_v7, 0.0  ;;  %v283_v55 = vmul.f32 %v555_v46, %v1033_v7  ;;  %s738_s27 = scalar_lea.vmem %s737_s29, 256  ;;  %p739_p6 = scmp.lt.s32.totalorder %s1183_s28, %s737_s29 }
  0x65   : > { %v380_v53 = vmul.f32 1.442695, %v378_v47  ;;  %v325_v56 = vmax.f32 %v1040_v14, 0.0  ;;  %v382_v57 = vmul.f32 1.442695, %v379_v50  ;;  %v326_v60 = vmax.f32 %v1045_v18, 0.0  ;;  %p735_p13 = pneg %p734_p12  ;;  %p740_p7 = scmp.lt.s32.totalorder %s738_s27, %s732_s6 }
  0x66   : > { %v327_v61 = vmul.f32 %v558_v49, %v1040_v14  ;;  %v328_v1 = vmul.f32 %v559_v52, %v1045_v18  ;;  %v1098_v2 = vsub.f32 %v235_v30, %v237_v40  ;;  %v1100_v3 = vsub.f32 %v236_v39, %v238_v44 }
  0x67   : > { %v1071_v38 = vpop.eup %640  ;;  %v1102_v4 = vsub.f32 %v280_v48, %v282_v51  ;;  %v1104_v6 = vsub.f32 %v281_v54, %v283_v55  ;;  %vm364_vm6 = vcmp.eq.s32.totalorder %v1035_v11, 4  ;;  %vm365_vm7 = vcmp.eq.s32.totalorder %v1042_v15, 4  ;;  %p741_p9 = por %p740_p7, %p739_p6 }
  0x68   : > { %v1076_v41 = vpop.eup %642  ;;  %v249_v42 = vadd.f32 1.0, %v1071_v38  ;;  %v252_v59 = vmul.f32 -0.5, %v1071_v38  ;;  %v1109_v13 = vsub.f32 %v325_v56, %v327_v61  ;;  %v1113_v17 = vsub.f32 %v326_v60, %v328_v1 }
  0x69   : > { %v258_v45 = vadd.f32 1.0, %v1076_v41  ;;  %v645_v58 = vpop.eup %644  ;;  %v261_v63 = vmul.f32 -0.5, %v1076_v41  ;;  %v255_v20 = vand.u32 2147483647, %v1071_v38  ;;  %v264_v11 = vand.u32 2147483647, %v1076_v41  ;;  %p742_p11 = pnand %p741_p9, %p735_p13 }
  0x6a   : > { %652 = vlog2.f32 %v249_v42  ;;  %v647_v62 = vpop.eup %646  ;;  %v294_v0 = vadd.f32 1.0, %v645_v58  ;;  %v297_v7 = vmul.f32 -0.5, %v645_v58  ;;  %v253_v10 = vadd.f32 1.0, %v252_v59 }
  0x6b   : > { %654 = vlog2.f32 %v258_v45  ;;  %v303_v5 = vadd.f32 1.0, %v647_v62  ;;  %v1107_v8 = vpop.eup %648  ;;  %v306_v12 = vmul.f32 -0.5, %v647_v62  ;;  %v262_v16 = vadd.f32 1.0, %v261_v63 }
  0x6c   : > { %656 = vpow2.f32 %v380_v53  ;;  %v1111_v14 = vpop.eup %650  ;;  %v339_v18 = vadd.f32 1.0, %v1107_v8  ;;  %v562_v22 = vsel %vm364_vm6, 1.0, %v825_v28  ;;  %v298_v24 = vadd.f32 1.0, %v297_v7 }
  0x6d   : > { %658 = vpow2.f32 %v382_v57  ;;  %v348_v21 = vadd.f32 1.0, %v1111_v14  ;;  %v300_v29 = vand.u32 2147483647, %v645_v58  ;;  %v309_v30 = vand.u32 2147483647, %v647_v62 }
  0x6e   : > { %660 = vlog2.f32 %v294_v0  ;;  %v254_v32 = vmul.f32 %v1071_v38, %v253_v10  ;;  %v307_v33 = vadd.f32 1.0, %v306_v12  ;;  %v342_v34 = vmul.f32 -0.5, %v1107_v8 }
  0x6f   : > { %662 = vlog2.f32 %v303_v5  ;;  %v263_v39 = vmul.f32 %v1076_v41, %v262_v16  ;;  %v351_v40 = vmul.f32 -0.5, %v1111_v14  ;;  %vm1125_vm8 = vcmp.lt.f32.partialorder %v255_v20, 0.0004427343 }
  0x70   : > { %664 = vlog2.f32 %v339_v18  ;;  %vm1129_vm9 = vcmp.lt.f32.partialorder %v264_v11, 0.0004427343  ;;  %v563_v38 = vsel %vm365_vm7, 1.0, %v825_v28  ;;  %v370_v45 = vmax.f32 %v1055_v25, 0.0 }
  0x71   : > { %666 = vlog2.f32 %v348_v21  ;;  %v299_v47 = vmul.f32 %v645_v58, %v298_v24  ;;  %vm1137_vm10 = vcmp.lt.f32.partialorder %v300_v29, 0.0004427343  ;;  %vm1141_vm11 = vcmp.lt.f32.partialorder %v309_v30, 0.0004427343 }
  0x72   : > { %v308_v50 = vmul.f32 %v647_v62, %v307_v33  ;;  %v343_v51 = vadd.f32 1.0, %v342_v34  ;;  %v345_v52 = vand.u32 2147483647, %v1107_v8  ;;  %v352_v55 = vadd.f32 1.0, %v351_v40 }
  0x73   : > { %v354_v58 = vand.u32 2147483647, %v1111_v14  ;;  %v371_v61 = vmax.f32 %v1058_v26, 0.0  ;;  %v372_v62 = vmul.f32 %v562_v22, %v1055_v25  ;;  %v409_v33 = vand.u32 127, %v406_v9 }
  0x74   : > { %v653_v23 = vpop.eup %652  ;;  %v344_v7 = vmul.f32 %v1107_v8, %v343_v51  ;;  %vm1161_vm12 = vcmp.lt.f32.partialorder %v345_v52, 0.0004427343  ;;  %v353_v25 = vmul.f32 %v1111_v14, %v352_v55  ;;  %v373_v8 = vmul.f32 %v563_v38, %v1058_v26 }
  0x75   : > { %v655_v31 = vpop.eup %654  ;;  %v251_v35 = vmul.f32 0.6931472, %v653_v23  ;;  %vm355_vm13 = vcmp.lt.f32.partialorder %v354_v58, 0.0004427343  ;;  %v414_v26 = vadd.s32 %v1069_v37, %v412_v27 }
  0x76   : > { %v260_v36 = vmul.f32 0.6931472, %v655_v31  ;;  %v657_v42 = vpop.eup %656 }
  0x77   : > { %v659_v46 = vpop.eup %658  ;;  %v384_v49 = vadd.f32 1.0, %v657_v42  ;;  %v257_v28 = vsel %vm1125_vm8, %v254_v32, %v251_v35  ;;  %v387_v59 = vmul.f32 -0.5, %v657_v42  ;;  %v390_v22 = vand.u32 2147483647, %v657_v42 }
  0x78   : > { %v393_v53 = vadd.f32 1.0, %v659_v46  ;;  %v661_v15 = vpop.eup %660  ;;  %v266_v54 = vsel %vm1129_vm9, %v263_v39, %v260_v36  ;;  %v396_v63 = vmul.f32 -0.5, %v659_v46  ;;  %v267_v0 = vadd.f32 %v257_v28, %v1098_v2 }
  0x79   : > { %668 = vlog2.f32 %v384_v49  ;;  %v663_v56 = vpop.eup %662  ;;  %v296_v57 = vmul.f32 0.6931472, %v661_v15  ;;  %v268_v1 = vadd.f32 %v266_v54, %v1100_v3  ;;  %v388_v11 = vadd.f32 1.0, %v387_v59 }
  0x7a   : > { %670 = vlog2.f32 %v393_v53  ;;  %v305_v60 = vmul.f32 0.6931472, %v663_v56  ;;  %v665_v10 = vpop.eup %664  ;;  %v397_v23 = vadd.f32 1.0, %v396_v63  ;;  %v399_v30 = vand.u32 2147483647, %v659_v46 }
  0x7b   : > { %v302_v5 = vsel %vm1137_vm10, %v299_v47, %v296_v57  ;;  %v667_v2 = vpop.eup %666  ;;  %v341_v20 = vmul.f32 0.6931472, %v665_v10  ;;  %v269_v24 = vadd.f32 %v268_v1, %v267_v0  ;;  %v389_v32 = vmul.f32 %v657_v42, %v388_v11 }
  0x7c   : > { %v311_v12 = vsel %vm1141_vm11, %v308_v50, %v305_v60  ;;  %v312_v16 = vadd.f32 %v302_v5, %v1102_v4  ;;  %v350_v21 = vmul.f32 0.6931472, %v667_v2  ;;  %v374_v35 = vsub.f32 %v370_v45, %v372_v62 }
  0x7d   : > { %v313_v3 = vadd.f32 %v311_v12, %v1104_v6  ;;  %v347_v4 = vsel %vm1161_vm12, %v344_v7, %v341_v20  ;;  %v375_v36 = vsub.f32 %v371_v61, %v373_v8  ;;  %vm391_vm14 = vcmp.lt.f32.partialorder %v390_v22, 0.0004427343 }
  0x7e   : > { %v356_v31 = vsel %vm355_vm13, %v353_v25, %v350_v21  ;;  %v357_v14 = vadd.f32 %v347_v4, %v1109_v13  ;;  %v398_v39 = vmul.f32 %v659_v46, %v397_v23  ;;  %vm400_vm15 = vcmp.lt.f32.partialorder %v399_v30, 0.0004427343 }
  0x7f   : > { %v314_v29 = vadd.f32 %v313_v3, %v312_v16  ;;  %v358_v6 = vadd.f32 %v356_v31, %v1113_v17  ;;  %v415_v19 = vadd.s32 %v414_v26, %v409_v33 }
  0x81   : > { %v315_v43 = vadd.f32 %v314_v29, %v269_v24  ;;  %v359_v44 = vadd.f32 %v358_v6, %v357_v14  ;;  %vm416_vm0 = vcmp.lt.s32.totalorder %v415_v19, 256 }
  0x83   : > { %v669_v34 = vpop.eup %668  ;;  %v360_v27 = vadd.f32 %v359_v44, %v315_v43 }
  0x84   : > { %v671_v40 = vpop.eup %670  ;;  %v386_v13 = vmul.f32 0.6931472, %v669_v34 }
  0x85   : > { %v395_v38 = vmul.f32 0.6931472, %v671_v40 }
  0x86   : > { %v392_v17 = vsel %vm391_vm14, %v389_v32, %v386_v13 }
  0x87   : > { %v401_v9 = vsel %vm400_vm15, %v398_v39, %v395_v38  ;;  %v402_v42 = vadd.f32 %v392_v17, %v374_v35 }
  0x88   : > { %v403_v37 = vadd.f32 %v401_v9, %v375_v36 }
  0x8a   : > { %v404_v45 = vadd.f32 %v403_v37, %v402_v42 }
  0x8c   : > { %v405_v47 = vadd.f32 %v404_v45, %v360_v27 }
  0x8e   : > { %v417_v46 = vsel %vm416_vm0, %v405_v47, 0.0 }
  0x8f   : > { %420 = vst [vmem:[%s217_s20] sm:$0xff] %v417_v46 }
  0x90   : > { %745 = shalt.err (!%p742_p11)
}
  0x91   : > { %s746_s4 = scalar_lea.hbm %s1181_s15, 128  ;;  %s750_s25 = scalar_lea.hbm %s1232_s2, 256 }
  0x92   : > { %p747_p5 = scmp.ne.s32.totalorder %s1181_s15, %s746_s4  ;;  %p751_p3 = scmp.lt.u32.totalorder %s1181_s15, %s1232_s2 }
  0x93   : > { %p752_p4 = scmp.lt.u32.totalorder %s750_s25, %s746_s4  ;;  %p754_p0 = scmp.lt.u32.totalorder %s746_s4, %s1181_s15 }
  0x94   : > { %p748_p10 = pnand %p747_p5, %p1252_p2 }
  0x95   : > { %p753_p8 = por %p752_p4, %p751_p3 }
  0x96   : > { %p749_p1 = pneg %p748_p10 }
  0x97   : > { %p755_p12 = por %p754_p0, %p753_p8 }
  0x99   : > { %p756_p13 = pnand %p755_p12, %p749_p1 }
  0x9b   : > { %759 = shalt.err (!%p756_p13)
}
  0x9c   : > { %573 = dma.vmem_to_hbm [thread:$0]  (%p1252_p2), %s1183_s28, 128, %s1181_s15, %s422_s26  }
  0x9d PF: > { %s447_s21 = sand.u32 1, %s798_s9   ;;  %p1253_p6 = scmp.ne.s32.totalorder %s1238_s24, 0 }
  0x9e   : > { %p1254_p7 = scmp.ge.s32.totalorder %s818_s14, 2  ;;  %s448_s8 = scalar_lea.sflag [#allocation4], %s447_s21 }
  0xa0   : > { %p583_p9 = pnand %p1254_p7, %p1253_p6 }
  0xa2   : > { %793 = dma.done.wait (!%p583_p9), %s448_s8, 128  }
  0xa3   : > { %795 = vsyncadd (!%p583_p9), %s448_s8, 4294967168  ;;  %s21_s14 = sadd.s32 1, %s818_s14   ;;  %s1255_s9 = smov %s802_s10 }
  0xa4   : > { %p18_p11 = scmp.ge.s32.totalorder %s21_s14, 4   ;;  %s1256_s10 = smov %s806_s11 }
  0xa5   : > { %s1257_s11 = smov %s898_s23  ;;  %s1258_s12 = smov %s814_s13 }
  0xa6   : > { %s1259_s13 = smov %s1261_s17  ;;  %20 = sbr.rel (!%p18_p11) target bundleno = 8 (0x8), region = 93 }
  0xad   :  { %453 = vsyncpa [#allocation3], 1 }
  0xae   :  { %455 = vsyncpa [#allocation3 + $0x1], 1 }
  0xaf   :  { %456 = vsyncpa [#allocation6], 1 }
  0xb0   :  { %458 = vsyncpa [#allocation6 + $0x1], 1 }
  0xb1   :  { %459 = vsyncpa [#allocation4], 1 }
  0xb2   :  { %461 = vsyncpa [#allocation4 + $0x1], 1 }

</bundles_post_ra>
